<compile_context>
chip_gen: v6e
topology: v6e:2x2x1
jax: 0.10.0
libtpu: 0.0.40
codegen_flags: <defaults>
</compile_context>

<pallas_src>
import functools

import jax
import jax.numpy as jnp
from jax.experimental import pallas as pl
from jax.experimental.pallas import tpu as pltpu

HIDDEN_SIZE = 8
# TODO(synk): NUM_OF_LINKS comes from wandb.config.NUM_OF_LINKS at runtime; fixed to 4 here.
NUM_OF_LINKS = 4
N_STATES = NUM_OF_LINKS * 2          # 8
IN_DIM = N_STATES + 1                # 9

# --- packed parameter slab layout: one 8-row band per layer ------------------
#   band rows [row0 : row0+8]:
#     cols 0:k_in   -> W^T  (output-dim on sublanes, input-dim on lanes)
#     col  BIAS_COL -> bias (output-dim on sublanes)
#   value head: W_v ([8,1]) stored as a column at col 0, b_v at (ROW_V, BIAS_COL)
ROW_L1, ROW_L2, ROW_L3, ROW_L4, ROW_V = 0, 8, 16, 24, 32
P_ROWS = 40
BIAS_COL = IN_DIM                    # column 9
P_COLS = IN_DIM + 1                  # 10


def _dense_relu_t(p, h_t, row0, k_in, relu=True):
    """[8, B] <- relu(W^T @ h_t + b); W^T stored at p[row0:row0+8, :k_in].

    Pure VPU: k_in broadcast-multiplies + adds of a single [8, B_TILE] vreg.
    """
    wt = lambda k: p[row0:row0 + HIDDEN_SIZE, k:k + 1]          # [8, 1]
    acc = p[row0:row0 + HIDDEN_SIZE, BIAS_COL:BIAS_COL + 1]     # bias  [8, 1]
    acc = acc + wt(0) * h_t[0:1, :]
    for k in range(1, k_in):                                    # static unroll
        acc = acc + wt(k) * h_t[k:k + 1, :]
    return jnp.maximum(acc, 0.0) if relu else acc


def mcts_critic_kernel(p_ref, xt_ref, out_ref):
    p = p_ref[...]                # [P_ROWS, P_COLS] packed weights + biases
    x_t = xt_ref[...]             # [IN_DIM, B_TILE] features x nodes

    h = _dense_relu_t(p, x_t, ROW_L1, IN_DIM)        # layer1 + relu
    h = _dense_relu_t(p, h, ROW_L2, HIDDEN_SIZE)     # layer2 + relu
    h = _dense_relu_t(p, h, ROW_L3, HIDDEN_SIZE)     # layer3 + relu
    h = _dense_relu_t(p, h, ROW_L4, HIDDEN_SIZE)     # layer4 + relu

    wv = p[ROW_V:ROW_V + HIDDEN_SIZE, 0:1]                      # [8, 1]
    bv = p[ROW_V:ROW_V + 1, BIAS_COL:BIAS_COL + 1]              # [1, 1]
    v = jnp.sum(wv * h, axis=0, keepdims=True) + bv             # [1, B_TILE]
    out_ref[...] = v[None, :, :].astype(out_ref.dtype)          # [1, 1, B_TILE]


def pack_params(params):
    """Pack the 5 (W, b) pairs into one [P_ROWS, P_COLS] f32 slab (one DMA)."""
    (w1, b1), (w2, b2), (w3, b3), (w4, b4), (wv, bv) = params
    slab = jnp.zeros((P_ROWS, P_COLS), jnp.float32)

    def band(s, row0, w, b):
        k_in = w.shape[0]
        s = s.at[row0:row0 + HIDDEN_SIZE, 0:k_in].set(w.T.astype(jnp.float32))
        s = s.at[row0:row0 + HIDDEN_SIZE, BIAS_COL].set(
            b.reshape(-1).astype(jnp.float32))
        return s

    slab = band(slab, ROW_L1, w1, b1)
    slab = band(slab, ROW_L2, w2, b2)
    slab = band(slab, ROW_L3, w3, b3)
    slab = band(slab, ROW_L4, w4, b4)
    slab = slab.at[ROW_V:ROW_V + HIDDEN_SIZE, 0:1].set(wv.astype(jnp.float32))
    slab = slab.at[ROW_V, BIAS_COL].set(bv.reshape(()).astype(jnp.float32))
    return slab


@functools.partial(jax.jit, static_argnames=("b_tile",))
def mcts_critic_forward(x, params, b_tile=128):
    """x: [N, N_STATES+1]  ->  state values [N, 1] (matches the torch module)."""
    n = x.shape[0]
    assert x.shape[1] == IN_DIM
    n_pad = ((n + b_tile - 1) // b_tile) * b_tile
    num_tiles = n_pad // b_tile

    # Transposed (feature-major, nodes on the lane axis), zero-padded node layout.
    x_t = jnp.zeros((IN_DIM, n_pad), jnp.float32).at[:, :n].set(
        x.astype(jnp.float32).T)
    slab = pack_params(params)

    out = pl.pallas_call(
        mcts_critic_kernel,
        out_shape=jax.ShapeDtypeStruct((num_tiles, 1, b_tile), jnp.float32),
        grid_spec=pltpu.PrefetchScalarGridSpec(
            num_scalar_prefetch=0,
            grid=(num_tiles,),
            in_specs=[
                # single tiny parameter slab; same block every step -> stays resident
                pl.BlockSpec((P_ROWS, P_COLS), lambda i: (0, 0)),
                # one tile of nodes per grid step, double-buffered by Pallas
                pl.BlockSpec((IN_DIM, b_tile), lambda i: (0, i)),
            ],
            out_specs=pl.BlockSpec((1, 1, b_tile), lambda i: (i, 0, 0)),
        ),
        compiler_params=pltpu.CompilerParams(
            dimension_semantics=("parallel",),   # shard node tiles across TCs (v7x)
        ),
    )(slab, x_t)

    return out.reshape(n_pad, 1)[:n]


def init_params(key):
    """Deterministic init matching nn.Linear: W ~ N(0, 0.02), b ~ U(+-1/sqrt(fan_in)).

    Weights stored as [fan_in, fan_out] (transposed vs. PyTorch) so the math is x @ W + b.
    """
    dims = [(IN_DIM, HIDDEN_SIZE),
            (HIDDEN_SIZE, HIDDEN_SIZE),
            (HIDDEN_SIZE, HIDDEN_SIZE),
            (HIDDEN_SIZE, HIDDEN_SIZE),
            (HIDDEN_SIZE, 1)]
    params = []
    for (fan_in, fan_out) in dims:
        key, kw, kb = jax.random.split(key, 3)
        w = 0.02 * jax.random.normal(kw, (fan_in, fan_out), dtype=jnp.float32)
        bound = 1.0 / jnp.sqrt(jnp.float32(fan_in))
        b = jax.random.uniform(kb, (1, fan_out), dtype=jnp.float32,
                               minval=-bound, maxval=bound)
        params.append((w, b))
    return params


def reference_forward(x, params):
    h = x
    for i, (w, b) in enumerate(params):
        h = h @ w + b
        if i < len(params) - 1:
            h = jnp.maximum(h, 0.0)
    return h


if __name__ == "__main__":
    key = jax.random.PRNGKey(0)
    key, kx = jax.random.split(key)

    N = 256                      # number of MCTS states to evaluate -> grid of 2 tiles
    x = jax.random.normal(kx, (N, IN_DIM), dtype=jnp.float32)
    params = init_params(key)

    out = mcts_critic_forward(x, params)
    out = jax.block_until_ready(out)

    ref = reference_forward(x, params)
    assert out.shape == (N, 1), out.shape
    assert jnp.allclose(out, ref, atol=1e-5, rtol=1e-5), (out, ref)

    print("KERNEL_OK")
</pallas_src>

<mosaic_0001>
module attributes {stable_mosaic.version = 11 : i64} {
  func.func @mcts_critic_kernel(%arg0: i32, %arg1: memref<40x10xf32, #tpu.memory_space<vmem>>, %arg2: memref<9x128xf32, #tpu.memory_space<vmem>>, %arg3: memref<1x1x128xf32, #tpu.memory_space<vmem>>) attributes {dimension_semantics = [#tpu.dimension_semantics<parallel>], iteration_bounds = array<i64: 2>, scalar_prefetch = 0 : i64, scratch_operands = 0 : i64, tpu.core_type = #tpu.core_type<tc>, window_params = [{pipeline_mode = #tpu.pipeline_mode<synchronous>, transform_indices = @transform_0, window_bounds = array<i64: 40, 10>}, {transform_indices = @transform_1, window_bounds = array<i64: 9, 128>}, {transform_indices = @transform_2, window_bounds = array<i64: 1, 1, 128>}]} {
    %c0 = arith.constant 0 : index
    %c0_0 = arith.constant 0 : index
    %0 = vector.load %arg1[%c0, %c0_0] : memref<40x10xf32, #tpu.memory_space<vmem>>, vector<40x10xf32>
    %c0_1 = arith.constant 0 : index
    %c0_2 = arith.constant 0 : index
    %1 = vector.load %arg2[%c0_1, %c0_2] : memref<9x128xf32, #tpu.memory_space<vmem>>, vector<9x128xf32>
    %2 = vector.extract_strided_slice %0 {offsets = [0, 9], sizes = [8, 1], strides = [1, 1]} : vector<40x10xf32> to vector<8x1xf32>
    %3 = vector.extract_strided_slice %0 {offsets = [0, 0], sizes = [8, 1], strides = [1, 1]} : vector<40x10xf32> to vector<8x1xf32>
    %4 = vector.extract_strided_slice %1 {offsets = [0, 0], sizes = [1, 128], strides = [1, 1]} : vector<9x128xf32> to vector<1x128xf32>
    %5 = vector.broadcast %3 : vector<8x1xf32> to vector<8x128xf32>
    %6 = vector.broadcast %4 : vector<1x128xf32> to vector<8x128xf32>
    %7 = arith.mulf %5, %6 : vector<8x128xf32>
    %8 = vector.broadcast %2 : vector<8x1xf32> to vector<8x128xf32>
    %9 = arith.addf %8, %7 : vector<8x128xf32>
    %10 = vector.extract_strided_slice %0 {offsets = [0, 1], sizes = [8, 1], strides = [1, 1]} : vector<40x10xf32> to vector<8x1xf32>
    %11 = vector.extract_strided_slice %1 {offsets = [1, 0], sizes = [1, 128], strides = [1, 1]} : vector<9x128xf32> to vector<1x128xf32>
    %12 = vector.broadcast %10 : vector<8x1xf32> to vector<8x128xf32>
    %13 = vector.broadcast %11 : vector<1x128xf32> to vector<8x128xf32>
    %14 = arith.mulf %12, %13 : vector<8x128xf32>
    %15 = arith.addf %9, %14 : vector<8x128xf32>
    %16 = vector.extract_strided_slice %0 {offsets = [0, 2], sizes = [8, 1], strides = [1, 1]} : vector<40x10xf32> to vector<8x1xf32>
    %17 = vector.extract_strided_slice %1 {offsets = [2, 0], sizes = [1, 128], strides = [1, 1]} : vector<9x128xf32> to vector<1x128xf32>
    %18 = vector.broadcast %16 : vector<8x1xf32> to vector<8x128xf32>
    %19 = vector.broadcast %17 : vector<1x128xf32> to vector<8x128xf32>
    %20 = arith.mulf %18, %19 : vector<8x128xf32>
    %21 = arith.addf %15, %20 : vector<8x128xf32>
    %22 = vector.extract_strided_slice %0 {offsets = [0, 3], sizes = [8, 1], strides = [1, 1]} : vector<40x10xf32> to vector<8x1xf32>
    %23 = vector.extract_strided_slice %1 {offsets = [3, 0], sizes = [1, 128], strides = [1, 1]} : vector<9x128xf32> to vector<1x128xf32>
    %24 = vector.broadcast %22 : vector<8x1xf32> to vector<8x128xf32>
    %25 = vector.broadcast %23 : vector<1x128xf32> to vector<8x128xf32>
    %26 = arith.mulf %24, %25 : vector<8x128xf32>
    %27 = arith.addf %21, %26 : vector<8x128xf32>
    %28 = vector.extract_strided_slice %0 {offsets = [0, 4], sizes = [8, 1], strides = [1, 1]} : vector<40x10xf32> to vector<8x1xf32>
    %29 = vector.extract_strided_slice %1 {offsets = [4, 0], sizes = [1, 128], strides = [1, 1]} : vector<9x128xf32> to vector<1x128xf32>
    %30 = vector.broadcast %28 : vector<8x1xf32> to vector<8x128xf32>
    %31 = vector.broadcast %29 : vector<1x128xf32> to vector<8x128xf32>
    %32 = arith.mulf %30, %31 : vector<8x128xf32>
    %33 = arith.addf %27, %32 : vector<8x128xf32>
    %34 = vector.extract_strided_slice %0 {offsets = [0, 5], sizes = [8, 1], strides = [1, 1]} : vector<40x10xf32> to vector<8x1xf32>
    %35 = vector.extract_strided_slice %1 {offsets = [5, 0], sizes = [1, 128], strides = [1, 1]} : vector<9x128xf32> to vector<1x128xf32>
    %36 = vector.broadcast %34 : vector<8x1xf32> to vector<8x128xf32>
    %37 = vector.broadcast %35 : vector<1x128xf32> to vector<8x128xf32>
    %38 = arith.mulf %36, %37 : vector<8x128xf32>
    %39 = arith.addf %33, %38 : vector<8x128xf32>
    %40 = vector.extract_strided_slice %0 {offsets = [0, 6], sizes = [8, 1], strides = [1, 1]} : vector<40x10xf32> to vector<8x1xf32>
    %41 = vector.extract_strided_slice %1 {offsets = [6, 0], sizes = [1, 128], strides = [1, 1]} : vector<9x128xf32> to vector<1x128xf32>
    %42 = vector.broadcast %40 : vector<8x1xf32> to vector<8x128xf32>
    %43 = vector.broadcast %41 : vector<1x128xf32> to vector<8x128xf32>
    %44 = arith.mulf %42, %43 : vector<8x128xf32>
    %45 = arith.addf %39, %44 : vector<8x128xf32>
    %46 = vector.extract_strided_slice %0 {offsets = [0, 7], sizes = [8, 1], strides = [1, 1]} : vector<40x10xf32> to vector<8x1xf32>
    %47 = vector.extract_strided_slice %1 {offsets = [7, 0], sizes = [1, 128], strides = [1, 1]} : vector<9x128xf32> to vector<1x128xf32>
    %48 = vector.broadcast %46 : vector<8x1xf32> to vector<8x128xf32>
    %49 = vector.broadcast %47 : vector<1x128xf32> to vector<8x128xf32>
    %50 = arith.mulf %48, %49 : vector<8x128xf32>
    %51 = arith.addf %45, %50 : vector<8x128xf32>
    %52 = vector.extract_strided_slice %0 {offsets = [0, 8], sizes = [8, 1], strides = [1, 1]} : vector<40x10xf32> to vector<8x1xf32>
    %53 = vector.extract_strided_slice %1 {offsets = [8, 0], sizes = [1, 128], strides = [1, 1]} : vector<9x128xf32> to vector<1x128xf32>
    %54 = vector.broadcast %52 : vector<8x1xf32> to vector<8x128xf32>
    %55 = vector.broadcast %53 : vector<1x128xf32> to vector<8x128xf32>
    %56 = arith.mulf %54, %55 : vector<8x128xf32>
    %57 = arith.addf %51, %56 : vector<8x128xf32>
    %cst = arith.constant 0.000000e+00 : f32
    %58 = vector.broadcast %cst : f32 to vector<8x128xf32>
    %59 = arith.maximumf %57, %58 : vector<8x128xf32>
    %60 = vector.extract_strided_slice %0 {offsets = [8, 9], sizes = [8, 1], strides = [1, 1]} : vector<40x10xf32> to vector<8x1xf32>
    %61 = vector.extract_strided_slice %0 {offsets = [8, 0], sizes = [8, 1], strides = [1, 1]} : vector<40x10xf32> to vector<8x1xf32>
    %62 = vector.extract_strided_slice %59 {offsets = [0, 0], sizes = [1, 128], strides = [1, 1]} : vector<8x128xf32> to vector<1x128xf32>
    %63 = vector.broadcast %61 : vector<8x1xf32> to vector<8x128xf32>
    %64 = vector.broadcast %62 : vector<1x128xf32> to vector<8x128xf32>
    %65 = arith.mulf %63, %64 : vector<8x128xf32>
    %66 = vector.broadcast %60 : vector<8x1xf32> to vector<8x128xf32>
    %67 = arith.addf %66, %65 : vector<8x128xf32>
    %68 = vector.extract_strided_slice %0 {offsets = [8, 1], sizes = [8, 1], strides = [1, 1]} : vector<40x10xf32> to vector<8x1xf32>
    %69 = vector.extract_strided_slice %59 {offsets = [1, 0], sizes = [1, 128], strides = [1, 1]} : vector<8x128xf32> to vector<1x128xf32>
    %70 = vector.broadcast %68 : vector<8x1xf32> to vector<8x128xf32>
    %71 = vector.broadcast %69 : vector<1x128xf32> to vector<8x128xf32>
    %72 = arith.mulf %70, %71 : vector<8x128xf32>
    %73 = arith.addf %67, %72 : vector<8x128xf32>
    %74 = vector.extract_strided_slice %0 {offsets = [8, 2], sizes = [8, 1], strides = [1, 1]} : vector<40x10xf32> to vector<8x1xf32>
    %75 = vector.extract_strided_slice %59 {offsets = [2, 0], sizes = [1, 128], strides = [1, 1]} : vector<8x128xf32> to vector<1x128xf32>
    %76 = vector.broadcast %74 : vector<8x1xf32> to vector<8x128xf32>
    %77 = vector.broadcast %75 : vector<1x128xf32> to vector<8x128xf32>
    %78 = arith.mulf %76, %77 : vector<8x128xf32>
    %79 = arith.addf %73, %78 : vector<8x128xf32>
    %80 = vector.extract_strided_slice %0 {offsets = [8, 3], sizes = [8, 1], strides = [1, 1]} : vector<40x10xf32> to vector<8x1xf32>
    %81 = vector.extract_strided_slice %59 {offsets = [3, 0], sizes = [1, 128], strides = [1, 1]} : vector<8x128xf32> to vector<1x128xf32>
    %82 = vector.broadcast %80 : vector<8x1xf32> to vector<8x128xf32>
    %83 = vector.broadcast %81 : vector<1x128xf32> to vector<8x128xf32>
    %84 = arith.mulf %82, %83 : vector<8x128xf32>
    %85 = arith.addf %79, %84 : vector<8x128xf32>
    %86 = vector.extract_strided_slice %0 {offsets = [8, 4], sizes = [8, 1], strides = [1, 1]} : vector<40x10xf32> to vector<8x1xf32>
    %87 = vector.extract_strided_slice %59 {offsets = [4, 0], sizes = [1, 128], strides = [1, 1]} : vector<8x128xf32> to vector<1x128xf32>
    %88 = vector.broadcast %86 : vector<8x1xf32> to vector<8x128xf32>
    %89 = vector.broadcast %87 : vector<1x128xf32> to vector<8x128xf32>
    %90 = arith.mulf %88, %89 : vector<8x128xf32>
    %91 = arith.addf %85, %90 : vector<8x128xf32>
    %92 = vector.extract_strided_slice %0 {offsets = [8, 5], sizes = [8, 1], strides = [1, 1]} : vector<40x10xf32> to vector<8x1xf32>
    %93 = vector.extract_strided_slice %59 {offsets = [5, 0], sizes = [1, 128], strides = [1, 1]} : vector<8x128xf32> to vector<1x128xf32>
    %94 = vector.broadcast %92 : vector<8x1xf32> to vector<8x128xf32>
    %95 = vector.broadcast %93 : vector<1x128xf32> to vector<8x128xf32>
    %96 = arith.mulf %94, %95 : vector<8x128xf32>
    %97 = arith.addf %91, %96 : vector<8x128xf32>
    %98 = vector.extract_strided_slice %0 {offsets = [8, 6], sizes = [8, 1], strides = [1, 1]} : vector<40x10xf32> to vector<8x1xf32>
    %99 = vector.extract_strided_slice %59 {offsets = [6, 0], sizes = [1, 128], strides = [1, 1]} : vector<8x128xf32> to vector<1x128xf32>
    %100 = vector.broadcast %98 : vector<8x1xf32> to vector<8x128xf32>
    %101 = vector.broadcast %99 : vector<1x128xf32> to vector<8x128xf32>
    %102 = arith.mulf %100, %101 : vector<8x128xf32>
    %103 = arith.addf %97, %102 : vector<8x128xf32>
    %104 = vector.extract_strided_slice %0 {offsets = [8, 7], sizes = [8, 1], strides = [1, 1]} : vector<40x10xf32> to vector<8x1xf32>
    %105 = vector.extract_strided_slice %59 {offsets = [7, 0], sizes = [1, 128], strides = [1, 1]} : vector<8x128xf32> to vector<1x128xf32>
    %106 = vector.broadcast %104 : vector<8x1xf32> to vector<8x128xf32>
    %107 = vector.broadcast %105 : vector<1x128xf32> to vector<8x128xf32>
    %108 = arith.mulf %106, %107 : vector<8x128xf32>
    %109 = arith.addf %103, %108 : vector<8x128xf32>
    %cst_3 = arith.constant 0.000000e+00 : f32
    %110 = vector.broadcast %cst_3 : f32 to vector<8x128xf32>
    %111 = arith.maximumf %109, %110 : vector<8x128xf32>
    %112 = vector.extract_strided_slice %0 {offsets = [16, 9], sizes = [8, 1], strides = [1, 1]} : vector<40x10xf32> to vector<8x1xf32>
    %113 = vector.extract_strided_slice %0 {offsets = [16, 0], sizes = [8, 1], strides = [1, 1]} : vector<40x10xf32> to vector<8x1xf32>
    %114 = vector.extract_strided_slice %111 {offsets = [0, 0], sizes = [1, 128], strides = [1, 1]} : vector<8x128xf32> to vector<1x128xf32>
    %115 = vector.broadcast %113 : vector<8x1xf32> to vector<8x128xf32>
    %116 = vector.broadcast %114 : vector<1x128xf32> to vector<8x128xf32>
    %117 = arith.mulf %115, %116 : vector<8x128xf32>
    %118 = vector.broadcast %112 : vector<8x1xf32> to vector<8x128xf32>
    %119 = arith.addf %118, %117 : vector<8x128xf32>
    %120 = vector.extract_strided_slice %0 {offsets = [16, 1], sizes = [8, 1], strides = [1, 1]} : vector<40x10xf32> to vector<8x1xf32>
    %121 = vector.extract_strided_slice %111 {offsets = [1, 0], sizes = [1, 128], strides = [1, 1]} : vector<8x128xf32> to vector<1x128xf32>
    %122 = vector.broadcast %120 : vector<8x1xf32> to vector<8x128xf32>
    %123 = vector.broadcast %121 : vector<1x128xf32> to vector<8x128xf32>
    %124 = arith.mulf %122, %123 : vector<8x128xf32>
    %125 = arith.addf %119, %124 : vector<8x128xf32>
    %126 = vector.extract_strided_slice %0 {offsets = [16, 2], sizes = [8, 1], strides = [1, 1]} : vector<40x10xf32> to vector<8x1xf32>
    %127 = vector.extract_strided_slice %111 {offsets = [2, 0], sizes = [1, 128], strides = [1, 1]} : vector<8x128xf32> to vector<1x128xf32>
    %128 = vector.broadcast %126 : vector<8x1xf32> to vector<8x128xf32>
    %129 = vector.broadcast %127 : vector<1x128xf32> to vector<8x128xf32>
    %130 = arith.mulf %128, %129 : vector<8x128xf32>
    %131 = arith.addf %125, %130 : vector<8x128xf32>
    %132 = vector.extract_strided_slice %0 {offsets = [16, 3], sizes = [8, 1], strides = [1, 1]} : vector<40x10xf32> to vector<8x1xf32>
    %133 = vector.extract_strided_slice %111 {offsets = [3, 0], sizes = [1, 128], strides = [1, 1]} : vector<8x128xf32> to vector<1x128xf32>
    %134 = vector.broadcast %132 : vector<8x1xf32> to vector<8x128xf32>
    %135 = vector.broadcast %133 : vector<1x128xf32> to vector<8x128xf32>
    %136 = arith.mulf %134, %135 : vector<8x128xf32>
    %137 = arith.addf %131, %136 : vector<8x128xf32>
    %138 = vector.extract_strided_slice %0 {offsets = [16, 4], sizes = [8, 1], strides = [1, 1]} : vector<40x10xf32> to vector<8x1xf32>
    %139 = vector.extract_strided_slice %111 {offsets = [4, 0], sizes = [1, 128], strides = [1, 1]} : vector<8x128xf32> to vector<1x128xf32>
    %140 = vector.broadcast %138 : vector<8x1xf32> to vector<8x128xf32>
    %141 = vector.broadcast %139 : vector<1x128xf32> to vector<8x128xf32>
    %142 = arith.mulf %140, %141 : vector<8x128xf32>
    %143 = arith.addf %137, %142 : vector<8x128xf32>
    %144 = vector.extract_strided_slice %0 {offsets = [16, 5], sizes = [8, 1], strides = [1, 1]} : vector<40x10xf32> to vector<8x1xf32>
    %145 = vector.extract_strided_slice %111 {offsets = [5, 0], sizes = [1, 128], strides = [1, 1]} : vector<8x128xf32> to vector<1x128xf32>
    %146 = vector.broadcast %144 : vector<8x1xf32> to vector<8x128xf32>
    %147 = vector.broadcast %145 : vector<1x128xf32> to vector<8x128xf32>
    %148 = arith.mulf %146, %147 : vector<8x128xf32>
    %149 = arith.addf %143, %148 : vector<8x128xf32>
    %150 = vector.extract_strided_slice %0 {offsets = [16, 6], sizes = [8, 1], strides = [1, 1]} : vector<40x10xf32> to vector<8x1xf32>
    %151 = vector.extract_strided_slice %111 {offsets = [6, 0], sizes = [1, 128], strides = [1, 1]} : vector<8x128xf32> to vector<1x128xf32>
    %152 = vector.broadcast %150 : vector<8x1xf32> to vector<8x128xf32>
    %153 = vector.broadcast %151 : vector<1x128xf32> to vector<8x128xf32>
    %154 = arith.mulf %152, %153 : vector<8x128xf32>
    %155 = arith.addf %149, %154 : vector<8x128xf32>
    %156 = vector.extract_strided_slice %0 {offsets = [16, 7], sizes = [8, 1], strides = [1, 1]} : vector<40x10xf32> to vector<8x1xf32>
    %157 = vector.extract_strided_slice %111 {offsets = [7, 0], sizes = [1, 128], strides = [1, 1]} : vector<8x128xf32> to vector<1x128xf32>
    %158 = vector.broadcast %156 : vector<8x1xf32> to vector<8x128xf32>
    %159 = vector.broadcast %157 : vector<1x128xf32> to vector<8x128xf32>
    %160 = arith.mulf %158, %159 : vector<8x128xf32>
    %161 = arith.addf %155, %160 : vector<8x128xf32>
    %cst_4 = arith.constant 0.000000e+00 : f32
    %162 = vector.broadcast %cst_4 : f32 to vector<8x128xf32>
    %163 = arith.maximumf %161, %162 : vector<8x128xf32>
    %164 = vector.extract_strided_slice %0 {offsets = [24, 9], sizes = [8, 1], strides = [1, 1]} : vector<40x10xf32> to vector<8x1xf32>
    %165 = vector.extract_strided_slice %0 {offsets = [24, 0], sizes = [8, 1], strides = [1, 1]} : vector<40x10xf32> to vector<8x1xf32>
    %166 = vector.extract_strided_slice %163 {offsets = [0, 0], sizes = [1, 128], strides = [1, 1]} : vector<8x128xf32> to vector<1x128xf32>
    %167 = vector.broadcast %165 : vector<8x1xf32> to vector<8x128xf32>
    %168 = vector.broadcast %166 : vector<1x128xf32> to vector<8x128xf32>
    %169 = arith.mulf %167, %168 : vector<8x128xf32>
    %170 = vector.broadcast %164 : vector<8x1xf32> to vector<8x128xf32>
    %171 = arith.addf %170, %169 : vector<8x128xf32>
    %172 = vector.extract_strided_slice %0 {offsets = [24, 1], sizes = [8, 1], strides = [1, 1]} : vector<40x10xf32> to vector<8x1xf32>
    %173 = vector.extract_strided_slice %163 {offsets = [1, 0], sizes = [1, 128], strides = [1, 1]} : vector<8x128xf32> to vector<1x128xf32>
    %174 = vector.broadcast %172 : vector<8x1xf32> to vector<8x128xf32>
    %175 = vector.broadcast %173 : vector<1x128xf32> to vector<8x128xf32>
    %176 = arith.mulf %174, %175 : vector<8x128xf32>
    %177 = arith.addf %171, %176 : vector<8x128xf32>
    %178 = vector.extract_strided_slice %0 {offsets = [24, 2], sizes = [8, 1], strides = [1, 1]} : vector<40x10xf32> to vector<8x1xf32>
    %179 = vector.extract_strided_slice %163 {offsets = [2, 0], sizes = [1, 128], strides = [1, 1]} : vector<8x128xf32> to vector<1x128xf32>
    %180 = vector.broadcast %178 : vector<8x1xf32> to vector<8x128xf32>
    %181 = vector.broadcast %179 : vector<1x128xf32> to vector<8x128xf32>
    %182 = arith.mulf %180, %181 : vector<8x128xf32>
    %183 = arith.addf %177, %182 : vector<8x128xf32>
    %184 = vector.extract_strided_slice %0 {offsets = [24, 3], sizes = [8, 1], strides = [1, 1]} : vector<40x10xf32> to vector<8x1xf32>
    %185 = vector.extract_strided_slice %163 {offsets = [3, 0], sizes = [1, 128], strides = [1, 1]} : vector<8x128xf32> to vector<1x128xf32>
    %186 = vector.broadcast %184 : vector<8x1xf32> to vector<8x128xf32>
    %187 = vector.broadcast %185 : vector<1x128xf32> to vector<8x128xf32>
    %188 = arith.mulf %186, %187 : vector<8x128xf32>
    %189 = arith.addf %183, %188 : vector<8x128xf32>
    %190 = vector.extract_strided_slice %0 {offsets = [24, 4], sizes = [8, 1], strides = [1, 1]} : vector<40x10xf32> to vector<8x1xf32>
    %191 = vector.extract_strided_slice %163 {offsets = [4, 0], sizes = [1, 128], strides = [1, 1]} : vector<8x128xf32> to vector<1x128xf32>
    %192 = vector.broadcast %190 : vector<8x1xf32> to vector<8x128xf32>
    %193 = vector.broadcast %191 : vector<1x128xf32> to vector<8x128xf32>
    %194 = arith.mulf %192, %193 : vector<8x128xf32>
    %195 = arith.addf %189, %194 : vector<8x128xf32>
    %196 = vector.extract_strided_slice %0 {offsets = [24, 5], sizes = [8, 1], strides = [1, 1]} : vector<40x10xf32> to vector<8x1xf32>
    %197 = vector.extract_strided_slice %163 {offsets = [5, 0], sizes = [1, 128], strides = [1, 1]} : vector<8x128xf32> to vector<1x128xf32>
    %198 = vector.broadcast %196 : vector<8x1xf32> to vector<8x128xf32>
    %199 = vector.broadcast %197 : vector<1x128xf32> to vector<8x128xf32>
    %200 = arith.mulf %198, %199 : vector<8x128xf32>
    %201 = arith.addf %195, %200 : vector<8x128xf32>
    %202 = vector.extract_strided_slice %0 {offsets = [24, 6], sizes = [8, 1], strides = [1, 1]} : vector<40x10xf32> to vector<8x1xf32>
    %203 = vector.extract_strided_slice %163 {offsets = [6, 0], sizes = [1, 128], strides = [1, 1]} : vector<8x128xf32> to vector<1x128xf32>
    %204 = vector.broadcast %202 : vector<8x1xf32> to vector<8x128xf32>
    %205 = vector.broadcast %203 : vector<1x128xf32> to vector<8x128xf32>
    %206 = arith.mulf %204, %205 : vector<8x128xf32>
    %207 = arith.addf %201, %206 : vector<8x128xf32>
    %208 = vector.extract_strided_slice %0 {offsets = [24, 7], sizes = [8, 1], strides = [1, 1]} : vector<40x10xf32> to vector<8x1xf32>
    %209 = vector.extract_strided_slice %163 {offsets = [7, 0], sizes = [1, 128], strides = [1, 1]} : vector<8x128xf32> to vector<1x128xf32>
    %210 = vector.broadcast %208 : vector<8x1xf32> to vector<8x128xf32>
    %211 = vector.broadcast %209 : vector<1x128xf32> to vector<8x128xf32>
    %212 = arith.mulf %210, %211 : vector<8x128xf32>
    %213 = arith.addf %207, %212 : vector<8x128xf32>
    %cst_5 = arith.constant 0.000000e+00 : f32
    %214 = vector.broadcast %cst_5 : f32 to vector<8x128xf32>
    %215 = arith.maximumf %213, %214 : vector<8x128xf32>
    %216 = vector.extract_strided_slice %0 {offsets = [32, 0], sizes = [8, 1], strides = [1, 1]} : vector<40x10xf32> to vector<8x1xf32>
    %217 = vector.extract_strided_slice %0 {offsets = [32, 9], sizes = [1, 1], strides = [1, 1]} : vector<40x10xf32> to vector<1x1xf32>
    %218 = vector.broadcast %216 : vector<8x1xf32> to vector<8x128xf32>
    %219 = arith.mulf %218, %215 : vector<8x128xf32>
    %cst_6 = arith.constant dense<0.000000e+00> : vector<128xf32>
    %220 = vector.multi_reduction <add>, %219, %cst_6 [0] : vector<8x128xf32> to vector<128xf32>
    %221 = vector.shape_cast %220 : vector<128xf32> to vector<1x128xf32>
    %222 = vector.broadcast %217 : vector<1x1xf32> to vector<1x128xf32>
    %223 = arith.addf %221, %222 : vector<1x128xf32>
    %224 = vector.shape_cast %223 : vector<1x128xf32> to vector<1x1x128xf32>
    %c0_7 = arith.constant 0 : index
    %c0_8 = arith.constant 0 : index
    %c0_9 = arith.constant 0 : index
    %225 = vector.load %arg3[%c0_7, %c0_8, %c0_9] : memref<1x1x128xf32, #tpu.memory_space<vmem>>, vector<1x1x128xf32>
    tpu.vector_store %arg3[%c0_7, %c0_8, %c0_9], %224 {strides = array<i32>} : memref<1x1x128xf32, #tpu.memory_space<vmem>>, vector<1x1x128xf32>,
    return
  }
  func.func @transform_0(%arg0: i32) -> (i32, i32) {
    %c0_i32 = arith.constant 0 : i32
    %c0_i32_0 = arith.constant 0 : i32
    %c0_i32_1 = arith.constant 0 : i32
    return %c0_i32, %c0_i32_0 : i32, i32
  }
  func.func @transform_1(%arg0: i32) -> (i32, i32) {
    %c0_i32 = arith.constant 0 : i32
    %c0_i32_0 = arith.constant 0 : i32
    return %c0_i32, %arg0 : i32, i32
  }
  func.func @transform_2(%arg0: i32) -> (i32, i32, i32) {
    %c0_i32 = arith.constant 0 : i32
    %c0_i32_0 = arith.constant 0 : i32
    %c0_i32_1 = arith.constant 0 : i32
    return %arg0, %c0_i32, %c0_i32_0 : i32, i32, i32
  }
}

</mosaic_0001>

<bundles_post_ra>
// kernel: mcts_critic_forward.1
= control target key start
LH: loop header
LB: loop body
LE: loop exit
PB: predicated region body
PF: predicated region fallthrough
CT: control target
= control target key end

     0   :  { %7 = vsyncpa [#allocation4], 0  ;;  %s1009_s0 = inlined_call_operand.vmem [shape: f32[40,10], index: 0, kind: input, shape index: {}]   ;;  %s1010_s1 = inlined_call_operand.vmem [shape: f32[9,256], index: 1, kind: input, shape index: {}]   ;;  %s1011_s2 = inlined_call_operand.hbm [shape: f32[2,1,128], index: 2, kind: output, shape index: {}]  }
   0x1   :  { %9 = vsyncpa [#allocation4 + $0x1], 0  ;;  %s820_s9 = smov 0   ;;  %s822_s10 = smov 0  }
   0x2   :  { %s824_s11 = smov 0   ;;  %s826_s12 = smov 0  }
   0x3 LB: > { %s632_s13 = sadd.s32 4294967295, %s792_s12   ;;  %s633_s14 = sadd.s32 4294967294, %s792_s12   ;;  %s792_s12 = sphi %s826_s12, %s1019_s12   ;;  %s788_s11 = sphi %s824_s11, %s1018_s11   ;;  %s784_s10 = sphi %s822_s10, %s1017_s10   ;;  %s780_s9 = sphi %s820_s9, %s1016_s9  }
   0x4   : > { %s843_s15 = sadd.s32 1, %s792_s12   ;;  %s43_s16 = sadd.s32 1, %s788_s11 }
   0x5   : > { %s40_s17 = ssub.s32 %s792_s12, %s843_s15  ;;  %p50_p0 = scmp.ne.s32.totalorder %s788_s11, %s784_s10 }
   0x6   : > { %p41_p1 = scmp.eq.s32.totalorder %s40_s17, 0  ;;  %p51_p2 = scmp.eq.s32.totalorder %s792_s12, 0 }
   0x7   : > { %p80_p3 = scmp.eq.s32.totalorder %s632_s13, 1  ;;  %p85_p4 = scmp.ne.s32.totalorder %s784_s10, %s780_s9 }
   0x8   : > { %s856_s18 = scalar_select %p41_p1, %s788_s11, %s43_s16  }
   0x9   : > { %p52_p5 = por %p51_p2, %p50_p0  ;;  %p858_p6 = por %p80_p3, %p50_p0 }
   0xa   : > { %p86_p7 = scmp.eq.s32.totalorder %s633_s14, 1  ;;  %p1012_p9 = scmp.ge.s32.totalorder %s792_s12, 2 }
   0xc   : > { %p862_p8 = por %p86_p7, %p85_p4  ;;  %105 = sbr.rel (%p1012_p9) target bundleno = 22 (0x16), region = 20 }
  0x11   : > { %108 = sbr.rel (!%p52_p5) target bundleno = 22 (0x16), region = 24  ;;  %s110_s21 = sand.u32 (%p52_p5), 1, %s788_s11  }
  0x12   : > { %s637_s22 = sshll.u32 (%p52_p5), %s792_s12, 3  ;;  %s636_s23 = sshll.u32 (%p52_p5), %s110_s21, 4 }
  0x13   : > { %s114_s26 = scalar_lea.vmem (%p52_p5), %s1010_s1, %s637_s22  ;;  %s112_s27 = scalar_lea.vmem (%p52_p5), [#allocation2], %s636_s23 }
  0x14   : > { %v145_v0 = vld [vmem:[%s114_s26] sm:$0xff] (%p52_p5)  ;;  %v147_v1 = vld [vmem:[%s114_s26 + $0x10] sm:$0xff] (%p52_p5) }
  0x15   : > { %146 = vst [vmem:[%s112_s27] sm:$0xff] (%p52_p5), %v145_v0  ;;  %148 = vst [vmem:[%s112_s27 + $0x8] sm:$0xff] (%p52_p5), %v147_v1 }
  0x16 PF: > { %p638_p10 = scmp.ge.s32.totalorder %s792_s12, 1  ;;  %p153_p11 = scmp.lt.s32.totalorder %s792_s12, 3 }
  0x18   : > { %p154_p12 = pnand %p638_p10, %p153_p11 }
  0x19   : > { %s915_s16 = sand.u32 (!%p154_p12), 1, %s784_s10   ;;  %s641_s22 = sshll.u32 (!%p154_p12), %s632_s13, 4 }
  0x1a   : > { %157 = sbr.rel (%p154_p12) target bundleno = 307 (0x133), region = 62  ;;  %s639_s17 = sshll.u32 (!%p154_p12), %s915_s16, 4 }
  0x1b   : > { %s922_s21 = scalar_lea.vmem (!%p154_p12), [#allocation2], %s639_s17  ;;  %s179_s23 = scalar_lea.vmem (!%p154_p12), [#allocation3], %s915_s16 }
  0x1c   : > { %s572_s24 = sshll.u32 (!%p154_p12), %s179_s23, 4  ;;  %s570_s27 = scalar_lea.hbm (!%p154_p12), %s1011_s2, %s641_s22  ;;  %s573_s24 = int_to_ptr.vmem [resolvable:$true] %s572_s24 }
  0x1d   : > { %s560_s28 = scalar_lea.sflag (!%p154_p12), [#allocation4], %s915_s16  ;;  %s732_s29 = scalar_lea.vmem (!%p154_p12), %s573_s24, 16 }
  0x1e   : > { %p733_p13 = scmp.ne.s32.totalorder (!%p154_p12), %s573_s24, %s732_s29  ;;  %s804_s30 = smov (!%p154_p12), [#allocation3]  }
  0x1f   : > { %v180_v2 = vld [vmem:[%s1009_s0] sm:$0xff]  ;;  %v794_v3 = vmov 1   ;;  %v795_v4 = vmov 0   ;;  %v796_v5 = vmov 2   ;;  %v797_v6 = vmov 9   ;;  %v181_v11 = vld [vmem:[%s1009_s0 + $0x8] sm:$0xff] }
  0x20   : > { %695 = vset.pattern.permute.xlu1 %v794_v3  ;;  %693 = vset.pattern.permute.xlu0 %v795_v4  ;;  %v798_v7 = vmov 3   ;;  %v799_v8 = vmov 4   ;;  %v800_v9 = vmov 5   ;;  %v801_v10 = vmov 7   ;;  %v182_v14 = vld [vmem:[%s1009_s0 + $0x10] sm:$0xff]  ;;  %v183_v15 = vld [vmem:[%s1009_s0 + $0x18] sm:$0xff]  ;;  %p734_p0 = pnand %p733_p13, %p858_p6 }
  0x21   : > { %203 = vperm.xlu1 %695, %v180_v2   ;;  %189 = vperm.xlu0 %693, %v180_v2   ;;  %v802_v12 = vmov 6   ;;  %v803_v13 = vmov 8   ;;  %v184_v16 = vld [vmem:[%s1009_s0 + $0x20] sm:$0xff]  ;;  %v192_v17 = vlaneseq  ;;  %v640_v60 = vld [vmem:[%s922_s21 + $0x8] ss:$0 sm:$0xff]  ;;  %s736_s3 = sshll.u32 %s804_s30, 4  ;;  %s737_s3 = int_to_ptr.vmem [resolvable:$false] %s736_s3 }
  0x22   : > { %v185_v20 = vld [vmem:[%s922_s21] sm:$0xff]  ;;  %p735_p1 = pneg %p734_p0  ;;  %s738_s13 = scalar_lea.vmem %s737_s3, 32 }
  0x23   : > { %v193_v18 = vshrl.u32 %v192_v17, 7  ;;  %p739_p2 = scmp.lt.s32.totalorder %s573_s24, %s737_s3  ;;  %p740_p3 = scmp.lt.s32.totalorder %s738_s13, %s732_s29 }
  0x25   : > { %696 = vset.pattern.permute.xlu1 %v796_v5  ;;  %694 = vset.pattern.permute.xlu0 %v797_v6  ;;  %v919_v19 = vsub.s32 0, %v193_v18  ;;  %v925_v21 = vsub.s32 1, %v193_v18  ;;  %v928_v25 = vsub.s32 2, %v193_v18  ;;  %v931_v28 = vsub.s32 3, %v193_v18  ;;  %p741_p4 = por %p740_p3, %p739_p2 }
  0x26   : > { %213 = vperm.xlu1 %696, %v180_v2   ;;  %198 = vperm.xlu0 %694, %v180_v2   ;;  %v934_v32 = vsub.s32 4, %v193_v18  ;;  %v937_v38 = vsub.s32 5, %v193_v18  ;;  %v941_v47 = vsub.s32 6, %v193_v18  ;;  %v943_v48 = vsub.s32 7, %v193_v18 }
  0x27   : > { %v195_v22 = vrot.slane %v185_v20, %v919_v19  ;;  %v209_v26 = vrot.slane %v185_v20, %v925_v21  ;;  %v219_v29 = vrot.slane %v185_v20, %v928_v25  ;;  %v229_v35 = vrot.slane %v185_v20, %v931_v28  ;;  %p742_p5 = pnand %p741_p4, %p735_p1 }
  0x28   : > { %v239_v39 = vrot.slane %v185_v20, %v934_v32  ;;  %v249_v44 = vrot.slane %v185_v20, %v937_v38  ;;  %v259_v52 = vrot.slane %v185_v20, %v941_v47  ;;  %v269_v53 = vrot.slane %v185_v20, %v943_v48 }
  0x2a   : > { %697 = vset.pattern.permute.xlu1 %v798_v7  ;;  %698 = vset.pattern.permute.xlu0 %v799_v8 }
  0x2b   : > { %223 = vperm.xlu1 %697, %v180_v2   ;;  %233 = vperm.xlu0 %698, %v180_v2  }
  0x2f   : > { %699 = vset.pattern.permute.xlu1 %v800_v9  ;;  %701 = vset.pattern.permute.xlu0 %v801_v10 }
  0x30   : > { %243 = vperm.xlu1 %699, %v180_v2   ;;  %263 = vperm.xlu0 %701, %v180_v2  }
  0x34   : > { %700 = vset.pattern.permute.xlu1 %v802_v12  ;;  %704 = vset.pattern.permute.xlu0 %v797_v6 }
  0x35   : > { %253 = vperm.xlu1 %700, %v180_v2   ;;  %294 = vperm.xlu0 %704, %v181_v11  }
  0x39   : > { %702 = vset.pattern.permute.xlu1 %v803_v13  ;;  %707 = vset.pattern.permute.xlu0 %v798_v7 }
  0x3a   : > { %273 = vperm.xlu1 %702, %v180_v2   ;;  %319 = vperm.xlu0 %707, %v181_v11  }
  0x3e   : > { %703 = vset.pattern.permute.xlu1 %v795_v4  ;;  %710 = vset.pattern.permute.xlu0 %v802_v12 }
  0x3f   : > { %285 = vperm.xlu1 %703, %v181_v11   ;;  %349 = vperm.xlu0 %710, %v181_v11  }
  0x43   : > { %705 = vset.pattern.permute.xlu1 %v794_v3  ;;  %713 = vset.pattern.permute.xlu0 %v797_v6 }
  0x44   : > { %299 = vperm.xlu1 %705, %v181_v11   ;;  %380 = vperm.xlu0 %713, %v182_v14  }
  0x48   : > { %706 = vset.pattern.permute.xlu1 %v796_v5  ;;  %716 = vset.pattern.permute.xlu0 %v798_v7 }
  0x49   : > { %309 = vperm.xlu1 %706, %v181_v11   ;;  %405 = vperm.xlu0 %716, %v182_v14  }
  0x4d   : > { %708 = vset.pattern.permute.xlu1 %v799_v8  ;;  %719 = vset.pattern.permute.xlu0 %v802_v12 }
  0x4e   : > { %329 = vperm.xlu1 %708, %v181_v11   ;;  %435 = vperm.xlu0 %719, %v182_v14  }
  0x52   : > { %709 = vset.pattern.permute.xlu1 %v800_v9  ;;  %722 = vset.pattern.permute.xlu0 %v797_v6 }
  0x53   : > { %339 = vperm.xlu1 %709, %v181_v11   ;;  %466 = vperm.xlu0 %722, %v183_v15  }
  0x57   : > { %711 = vset.pattern.permute.xlu1 %v801_v10  ;;  %725 = vset.pattern.permute.xlu0 %v798_v7 }
  0x58   : > { %359 = vperm.xlu1 %711, %v181_v11   ;;  %491 = vperm.xlu0 %725, %v183_v15  }
  0x5c   : > { %712 = vset.pattern.permute.xlu1 %v795_v4  ;;  %728 = vset.pattern.permute.xlu0 %v802_v12 }
  0x5d   : > { %371 = vperm.xlu1 %712, %v182_v14   ;;  %521 = vperm.xlu0 %728, %v183_v15  }
  0x61   : > { %714 = vset.pattern.permute.xlu1 %v794_v3  ;;  %731 = vset.pattern.permute.xlu0 %v797_v6 }
  0x62   : > { %385 = vperm.xlu1 %714, %v182_v14   ;;  %554 = vperm.xlu0 %731, %v184_v16  }
  0x66   : > { %715 = vset.pattern.permute.xlu1 %v796_v5 }
  0x67   : > { %395 = vperm.xlu1 %715, %v182_v14  }
  0x6b   : > { %717 = vset.pattern.permute.xlu1 %v799_v8 }
  0x6c   : > { %415 = vperm.xlu1 %717, %v182_v14  }
  0x70   : > { %718 = vset.pattern.permute.xlu1 %v800_v9 }
  0x71   : > { %425 = vperm.xlu1 %718, %v182_v14  }
  0x75   : > { %720 = vset.pattern.permute.xlu1 %v801_v10 }
  0x76   : > { %445 = vperm.xlu1 %720, %v182_v14  }
  0x7a   : > { %721 = vset.pattern.permute.xlu1 %v795_v4 }
  0x7b   : > { %457 = vperm.xlu1 %721, %v183_v15  }
  0x7f   : > { %723 = vset.pattern.permute.xlu1 %v794_v3 }
  0x80   : > { %471 = vperm.xlu1 %723, %v183_v15  }
  0x84   : > { %724 = vset.pattern.permute.xlu1 %v796_v5 }
  0x85   : > { %481 = vperm.xlu1 %724, %v183_v15  }
  0x89   : > { %726 = vset.pattern.permute.xlu1 %v799_v8 }
  0x8a   : > { %501 = vperm.xlu1 %726, %v183_v15  }
  0x8e   : > { %727 = vset.pattern.permute.xlu1 %v800_v9 }
  0x8f   : > { %511 = vperm.xlu1 %727, %v183_v15  }
  0x93   : > { %729 = vset.pattern.permute.xlu1 %v801_v10 }
  0x94   : > { %531 = vperm.xlu1 %729, %v183_v15  }
  0x98   : > { %730 = vset.pattern.permute.xlu1 %v795_v4 }
  0x99   : > { %543 = vperm.xlu1 %730, %v184_v16  }
  0x9c   : > { %v204_v23 = vpop.permute.xlu1 %203  ;;  %v190_v24 = vpop.permute.xlu0 %189 }
  0x9d   : > { %v196_v27 = vmul.f32 %v195_v22, %v190_v24  ;;  %v210_v33 = vmul.f32 %v209_v26, %v204_v23 }
  0xa1   : > { %v214_v30 = vpop.permute.xlu1 %213  ;;  %v199_v31 = vpop.permute.xlu0 %198 }
  0xa2   : > { %v201_v34 = vadd.f32 %v199_v31, %v196_v27  ;;  %v220_v36 = vmul.f32 %v219_v29, %v214_v30 }
  0xa4   : > { %v211_v37 = vadd.f32 %v210_v33, %v201_v34 }
  0xa6   : > { %v224_v40 = vpop.permute.xlu1 %223  ;;  %v221_v41 = vadd.f32 %v220_v36, %v211_v37  ;;  %v234_v42 = vpop.permute.xlu0 %233 }
  0xa7   : > { %v230_v43 = vmul.f32 %v229_v35, %v224_v40  ;;  %v240_v46 = vmul.f32 %v239_v39, %v234_v42 }
  0xa9   : > { %v231_v45 = vadd.f32 %v230_v43, %v221_v41 }
  0xab   : > { %v244_v49 = vpop.permute.xlu1 %243  ;;  %v241_v50 = vadd.f32 %v240_v46, %v231_v45  ;;  %v264_v54 = vpop.permute.xlu0 %263 }
  0xac   : > { %v250_v51 = vmul.f32 %v249_v44, %v244_v49  ;;  %v270_v58 = vmul.f32 %v269_v53, %v264_v54 }
  0xae   : > { %v251_v56 = vadd.f32 %v250_v51, %v241_v50 }
  0xb0   : > { %v254_v55 = vpop.permute.xlu1 %253  ;;  %v295_v7 = vpop.permute.xlu0 %294 }
  0xb1   : > { %v260_v57 = vmul.f32 %v259_v52, %v254_v55 }
  0xb3   : > { %v261_v59 = vadd.f32 %v260_v57, %v251_v56 }
  0xb5   : > { %v271_v61 = vadd.f32 %v270_v58, %v261_v59  ;;  %v274_v62 = vpop.permute.xlu1 %273  ;;  %v320_v16 = vpop.permute.xlu0 %319 }
  0xb6   : > { %v280_v63 = vmul.f32 %v640_v60, %v274_v62 }
  0xb8   : > { %v281_v0 = vadd.f32 %v280_v63, %v271_v61 }
  0xba   : > { %v282_v1 = vmax.f32 %v281_v0, 0.0  ;;  %v286_v2 = vpop.permute.xlu1 %285  ;;  %v350_v27 = vpop.permute.xlu0 %349 }
  0xbc   : > { %v291_v3 = vrot.slane %v282_v1, %v919_v19  ;;  %v305_v6 = vrot.slane %v282_v1, %v925_v21  ;;  %v315_v10 = vrot.slane %v282_v1, %v928_v25  ;;  %v325_v12 = vrot.slane %v282_v1, %v931_v28 }
  0xbd   : > { %v335_v20 = vrot.slane %v282_v1, %v934_v32  ;;  %v355_v24 = vrot.slane %v282_v1, %v941_v47  ;;  %v345_v26 = vrot.slane %v282_v1, %v937_v38  ;;  %v365_v35 = vrot.slane %v282_v1, %v943_v48 }
  0xbe   : > { %v292_v4 = vmul.f32 %v291_v3, %v286_v2  ;;  %v326_v17 = vmul.f32 %v325_v12, %v320_v16 }
  0xbf   : > { %v300_v5 = vpop.permute.xlu1 %299  ;;  %v356_v33 = vmul.f32 %v355_v24, %v350_v27  ;;  %v381_v49 = vpop.permute.xlu0 %380 }
  0xc0   : > { %v297_v8 = vadd.f32 %v295_v7, %v292_v4  ;;  %v306_v9 = vmul.f32 %v305_v6, %v300_v5 }
  0xc2   : > { %v307_v13 = vadd.f32 %v306_v9, %v297_v8 }
  0xc4   : > { %v310_v11 = vpop.permute.xlu1 %309  ;;  %v406_v58 = vpop.permute.xlu0 %405 }
  0xc5   : > { %v316_v14 = vmul.f32 %v315_v10, %v310_v11 }
  0xc7   : > { %v317_v15 = vadd.f32 %v316_v14, %v307_v13 }
  0xc9   : > { %v330_v18 = vpop.permute.xlu1 %329  ;;  %v327_v22 = vadd.f32 %v326_v17, %v317_v15  ;;  %v436_v2 = vpop.permute.xlu0 %435 }
  0xca   : > { %v336_v23 = vmul.f32 %v335_v20, %v330_v18 }
  0xcc   : > { %v337_v30 = vadd.f32 %v336_v23, %v327_v22 }
  0xce   : > { %v340_v29 = vpop.permute.xlu1 %339  ;;  %v467_v20 = vpop.permute.xlu0 %466 }
  0xcf   : > { %v346_v31 = vmul.f32 %v345_v26, %v340_v29 }
  0xd1   : > { %v347_v34 = vadd.f32 %v346_v31, %v337_v30 }
  0xd3   : > { %v360_v36 = vpop.permute.xlu1 %359  ;;  %v357_v37 = vadd.f32 %v356_v33, %v347_v34  ;;  %v492_v33 = vpop.permute.xlu0 %491 }
  0xd4   : > { %v366_v39 = vmul.f32 %v365_v35, %v360_v36 }
  0xd6   : > { %v367_v40 = vadd.f32 %v366_v39, %v357_v37 }
  0xd8   : > { %v368_v41 = vmax.f32 %v367_v40, 0.0  ;;  %v372_v42 = vpop.permute.xlu1 %371  ;;  %v522_v40 = vpop.permute.xlu0 %521 }
  0xda   : > { %v377_v43 = vrot.slane %v368_v41, %v919_v19  ;;  %v391_v46 = vrot.slane %v368_v41, %v925_v21  ;;  %v401_v52 = vrot.slane %v368_v41, %v928_v25  ;;  %v411_v54 = vrot.slane %v368_v41, %v931_v28 }
  0xdb   : > { %v421_v61 = vrot.slane %v368_v41, %v934_v32  ;;  %v441_v0 = vrot.slane %v368_v41, %v941_v47  ;;  %v431_v1 = vrot.slane %v368_v41, %v937_v38  ;;  %v451_v8 = vrot.slane %v368_v41, %v943_v48 }
  0xdc   : > { %v378_v44 = vmul.f32 %v377_v43, %v372_v42  ;;  %v412_v59 = vmul.f32 %v411_v54, %v406_v58 }
  0xdd   : > { %v386_v45 = vpop.permute.xlu1 %385  ;;  %v442_v6 = vmul.f32 %v441_v0, %v436_v2 }
  0xde   : > { %v383_v50 = vadd.f32 %v381_v49, %v378_v44  ;;  %v392_v51 = vmul.f32 %v391_v46, %v386_v45 }
  0xe0   : > { %v393_v55 = vadd.f32 %v392_v51, %v383_v50 }
  0xe2   : > { %v396_v53 = vpop.permute.xlu1 %395 }
  0xe3   : > { %v402_v56 = vmul.f32 %v401_v52, %v396_v53 }
  0xe5   : > { %v403_v57 = vadd.f32 %v402_v56, %v393_v55  ;;  %v555_v56 = vpop.permute.xlu0 %554 }
  0xe7   : > { %v416_v60 = vpop.permute.xlu1 %415  ;;  %v413_v62 = vadd.f32 %v412_v59, %v403_v57 }
  0xe8   : > { %v422_v63 = vmul.f32 %v421_v61, %v416_v60 }
  0xea   : > { %v423_v4 = vadd.f32 %v422_v63, %v413_v62 }
  0xec   : > { %v426_v3 = vpop.permute.xlu1 %425 }
  0xed   : > { %v432_v5 = vmul.f32 %v431_v1, %v426_v3 }
  0xef   : > { %v433_v7 = vadd.f32 %v432_v5, %v423_v4 }
  0xf1   : > { %v446_v9 = vpop.permute.xlu1 %445  ;;  %v443_v10 = vadd.f32 %v442_v6, %v433_v7 }
  0xf2   : > { %v452_v11 = vmul.f32 %v451_v8, %v446_v9 }
  0xf4   : > { %v453_v12 = vadd.f32 %v452_v11, %v443_v10 }
  0xf6   : > { %v454_v13 = vmax.f32 %v453_v12, 0.0  ;;  %v458_v14 = vpop.permute.xlu1 %457 }
  0xf8   : > { %v463_v15 = vrot.slane %v454_v13, %v919_v19  ;;  %v477_v18 = vrot.slane %v454_v13, %v925_v21  ;;  %v487_v24 = vrot.slane %v454_v13, %v928_v25  ;;  %v497_v27 = vrot.slane %v454_v13, %v931_v28 }
  0xf9   : > { %v507_v19 = vrot.slane %v454_v13, %v934_v32  ;;  %v527_v21 = vrot.slane %v454_v13, %v941_v47  ;;  %v517_v39 = vrot.slane %v454_v13, %v937_v38  ;;  %v537_v44 = vrot.slane %v454_v13, %v943_v48 }
  0xfa   : > { %v464_v16 = vmul.f32 %v463_v15, %v458_v14  ;;  %v498_v34 = vmul.f32 %v497_v27, %v492_v33 }
  0xfb   : > { %v472_v17 = vpop.permute.xlu1 %471  ;;  %v528_v43 = vmul.f32 %v527_v21, %v522_v40 }
  0xfc   : > { %v469_v22 = vadd.f32 %v467_v20, %v464_v16  ;;  %v478_v23 = vmul.f32 %v477_v18, %v472_v17 }
  0xfe   : > { %v479_v29 = vadd.f32 %v478_v23, %v469_v22 }
 0x100   : > { %v482_v26 = vpop.permute.xlu1 %481 }
 0x101   : > { %v488_v30 = vmul.f32 %v487_v24, %v482_v26 }
 0x103   : > { %v489_v31 = vadd.f32 %v488_v30, %v479_v29 }
 0x105   : > { %v502_v35 = vpop.permute.xlu1 %501  ;;  %v499_v36 = vadd.f32 %v498_v34, %v489_v31 }
 0x106   : > { %v508_v37 = vmul.f32 %v507_v19, %v502_v35 }
 0x108   : > { %v509_v25 = vadd.f32 %v508_v37, %v499_v36 }
 0x10a   : > { %v512_v41 = vpop.permute.xlu1 %511 }
 0x10b   : > { %v518_v42 = vmul.f32 %v517_v39, %v512_v41 }
 0x10d   : > { %v519_v28 = vadd.f32 %v518_v42, %v509_v25 }
 0x10f   : > { %v532_v45 = vpop.permute.xlu1 %531  ;;  %v529_v46 = vadd.f32 %v528_v43, %v519_v28 }
 0x110   : > { %v538_v49 = vmul.f32 %v537_v44, %v532_v45 }
 0x112   : > { %v539_v32 = vadd.f32 %v538_v49, %v529_v46 }
 0x114   : > { %v544_v50 = vpop.permute.xlu1 %543  ;;  %v540_v51 = vmax.f32 %v539_v32, 0.0 }
 0x116   : > { %v546_v47 = vmul.f32 %v544_v50, %v540_v51 }
 0x118   : > { %v547_v52 = vrot.slane %v546_v47, 4 }
 0x11a   : > { %v548_v38 = vadd.f32 %v547_v52, %v546_v47 }
 0x11c   : > { %v549_v53 = vrot.slane %v548_v38, 2 }
 0x11e   : > { %v550_v54 = vadd.f32 %v549_v53, %v548_v38 }
 0x120   : > { %v551_v55 = vrot.slane %v550_v54, 1 }
 0x122   : > { %v552_v48 = vadd.f32 %v551_v55, %v550_v54 }
 0x124   : > { %v557_v57 = vadd.f32 %v555_v56, %v552_v48 }
 0x126   : > { %558 = vst [vmem:[%s179_s23] sm:$0x1] %v557_v57 }
 0x127   : > { %745 = shalt.err (!%p742_p5)
}
 0x128   : > { %s746_s4 = scalar_lea.hbm %s570_s27, 16  ;;  %s750_s7 = scalar_lea.hbm %s1011_s2, 32 }
 0x129   : > { %p747_p7 = scmp.ne.s32.totalorder %s570_s27, %s746_s4  ;;  %p751_p12 = scmp.lt.s32.totalorder %s570_s27, %s1011_s2 }
 0x12a   : > { %p752_p13 = scmp.lt.s32.totalorder %s750_s7, %s746_s4 }
 0x12b   : > { %p748_p10 = pnand %p747_p7, %p858_p6 }
 0x12c   : > { %p753_p0 = por %p752_p13, %p751_p12 }
 0x12d   : > { %p749_p11 = pneg %p748_p10 }
 0x12f   : > { %p754_p9 = pnand %p753_p0, %p749_p11 }
 0x131   : > { %757 = shalt.err (!%p754_p9)
}
 0x132   : > { %644 = dma.vmem_to_hbm [thread:$0]  (%p858_p6), %s573_s24, 16, %s570_s27, %s560_s28  }
 0x133 PF: > { %s584_s16 = sand.u32 1, %s780_s9   ;;  %p1015_p1 = scmp.ge.s32.totalorder %s792_s12, 2 }
 0x134   : > { %s585_s17 = scalar_lea.sflag [#allocation4], %s584_s16 }
 0x135   : > { %p647_p2 = pnand %p1015_p1, %p862_p8 }
 0x137   : > { %p648_p3 = pneg %p647_p2 }
 0x139   : > { %775 = dma.done.wait (%p648_p3), %s585_s17, 16  }
 0x13a   : > { %777 = vsyncadd (%p648_p3), %s585_s17, 4294967280  ;;  %p12_p9 = scmp.ge.s32.totalorder %s843_s15, 4   ;;  %s1016_s9 = smov %s784_s10 }
 0x13b   : > { %s1017_s10 = smov %s788_s11  ;;  %s1018_s11 = smov %s856_s18 }
 0x13c   : > { %s1019_s12 = smov %s843_s15  ;;  %14 = sbr.rel (!%p12_p9) target bundleno = 3 (0x3), region = 106 }
 0x141   :  { %589 = vsyncpa [#allocation4], 1 }
 0x142   :  { %591 = vsyncpa [#allocation4 + $0x1], 1 }

</bundles_post_ra>
